<compile_context>
chip_gen: v7x
topology: tpu7x:2x2x1
jax: 0.10.0
libtpu: 0.0.40
codegen_flags: <defaults>
</compile_context>

<pallas_src>
import functools

import jax
import jax.numpy as jnp
from jax.experimental import pallas as pl
from jax.experimental.pallas import tpu as pltpu

LANE = 128
SUBLANE = 8


def _pad2(a, rows, cols):
    return jnp.pad(a, ((0, rows - a.shape[0]), (0, cols - a.shape[1])))


def _mlp_kernel(x_ref, w_ref, b_ref, out_ref, *, num_classes):
    # x_ref: (B_pad, 128) f32   w_ref: (384, 128) bf16   b_ref: (8, 128) f32
    # out_ref: (3, B_pad, 128) f32  -> [0]=logits, [1]=softmax, [2]=log_softmax
    x_b = x_ref[...].astype(jnp.bfloat16)
    biases = b_ref[...]
    b1 = biases[0:1, :]
    b2 = biases[1:2, :]
    b3 = biases[2:3, :]

    # layer 0: Linear + ReLU (bf16 MXU operands, f32 accumulate/epilogue)
    h = jnp.dot(x_b, w_ref[0:LANE, :], preferred_element_type=jnp.float32) + b1
    h = jnp.maximum(h, 0.0)
    # layer 1: Linear + ReLU
    h = jnp.dot(h.astype(jnp.bfloat16), w_ref[LANE:2 * LANE, :],
                preferred_element_type=jnp.float32) + b2
    h = jnp.maximum(h, 0.0)
    # layer 2: Linear (logits); padded lanes are exactly 0 (zero-padded W3/b3)
    logits = jnp.dot(h.astype(jnp.bfloat16), w_ref[2 * LANE:3 * LANE, :],
                     preferred_element_type=jnp.float32) + b3

    # Numerically-stable softmax / log_softmax over the valid class lanes only.
    lane_idx = jax.lax.broadcasted_iota(jnp.int32, logits.shape, 1)
    valid = lane_idx < num_classes
    masked = jnp.where(valid, logits, -1e30)         # kill padded lanes
    m = jnp.max(masked, axis=-1, keepdims=True)
    z = masked - m
    e = jnp.exp(z)                                    # padded lanes underflow to 0
    s = jnp.sum(e, axis=-1, keepdims=True)
    inv = pl.reciprocal(s, approx=True)               # EUP, not VALU divide
    sm = e * inv
    lsm = jnp.where(valid, z - jnp.log(s), 0.0)

    out_ref[0, :, :] = logits
    out_ref[1, :, :] = sm
    out_ref[2, :, :] = lsm


def mlp_classifier_forward(x, params):
    """params = ((W1, b1), (W2, b2), (W3, b3)); Wi is (in, out), bi is (1, out).

    Returns (logits, softmax, log_softmax), matching MLPClassifier.forward.
    """
    (w1, b1), (w2, b2), (w3, b3) = params
    in_size, h1 = w1.shape
    h2 = w2.shape[1]
    num_classes = w3.shape[1]
    B = x.shape[0]
    B_pad = -(-B // SUBLANE) * SUBLANE

    # --- host-side packing into two lane-dense slabs -------------------------
    w_slab = jnp.concatenate(
        [_pad2(w1, LANE, LANE), _pad2(w2, LANE, LANE), _pad2(w3, LANE, LANE)],
        axis=0,
    ).astype(jnp.bfloat16)                            # (384, 128) bf16
    b_slab = jnp.concatenate(
        [_pad2(b1, 1, LANE), _pad2(b2, 1, LANE), _pad2(b3, 1, LANE),
         jnp.zeros((SUBLANE - 3, LANE), jnp.float32)],
        axis=0,
    ).astype(jnp.float32)                             # (8, 128) f32
    x_pad = _pad2(x.astype(jnp.float32), B_pad, LANE)  # (B_pad, 128) f32

    vmem = pl.BlockSpec(memory_space=pltpu.MemorySpace.VMEM)
    cost = pl.CostEstimate(
        flops=2 * B * (in_size * h1 + h1 * h2 + h2 * num_classes),
        transcendentals=2 * B * num_classes,
        bytes_accessed=(x_pad.size * 4 + w_slab.size * 2 + b_slab.size * 4
                        + 3 * B_pad * LANE * 4),
    )

    out = pl.pallas_call(
        functools.partial(_mlp_kernel, num_classes=num_classes),
        out_shape=jax.ShapeDtypeStruct((3, B_pad, LANE), jnp.float32),
        in_specs=[vmem, vmem, vmem],
        out_specs=vmem,
        cost_estimate=cost,
    )(x_pad, w_slab, b_slab)

    logits = out[0, :B, :num_classes]
    softmax_out = out[1, :B, :num_classes]
    log_softmax_out = out[2, :B, :num_classes]
    return logits, softmax_out, log_softmax_out


def init_params(key, input_size, num_classes, hidden_sizes=(50, 10)):
    """Deterministic init mimicking nn.Linear's default U(-1/sqrt(fan_in), +1/sqrt(fan_in))."""
    layer_sizes = [input_size] + list(hidden_sizes) + [num_classes]
    params = []
    for i in range(len(layer_sizes) - 1):
        fan_in, fan_out = layer_sizes[i], layer_sizes[i + 1]
        key, kw, kb = jax.random.split(key, 3)
        bound = 1.0 / (fan_in ** 0.5)
        w = jax.random.uniform(kw, (fan_in, fan_out), jnp.float32, -bound, bound)
        b = jax.random.uniform(kb, (1, fan_out), jnp.float32, -bound, bound)
        params.append((w, b))
    return tuple(params)


def reference_forward(x, params):
    """Pure-JAX reference (same bf16-operand / f32-accumulate matmul recipe)."""
    h = x
    n = len(params)
    for i, (w, b) in enumerate(params):
        h = jnp.dot(h.astype(jnp.bfloat16), w.astype(jnp.bfloat16),
                    preferred_element_type=jnp.float32) + b
        if i < n - 1:
            h = jnp.maximum(h, 0.0)
    sm = jax.nn.softmax(h, axis=-1)
    lsm = jax.nn.log_softmax(h, axis=-1)
    return h, sm, lsm


if __name__ == "__main__":
    key = jax.random.PRNGKey(0)
    key, kx, kp = jax.random.split(key, 3)

    batch = 8
    input_size = 32
    num_classes = 8
    hidden_sizes = (50, 10)  # module default
    # TODO(synk): forward's `sample_weight` arg is unused by the PyTorch module, so it is omitted.

    x = jax.random.normal(kx, (batch, input_size), jnp.float32)
    params = init_params(kp, input_size, num_classes, hidden_sizes)

    logits, softmax_out, log_softmax_out = mlp_classifier_forward(x, params)
    jax.block_until_ready((logits, softmax_out, log_softmax_out))

    ref_logits, ref_sm, ref_lsm = reference_forward(x, params)
    assert jnp.allclose(logits, ref_logits, atol=5e-3, rtol=5e-3)
    assert jnp.allclose(softmax_out, ref_sm, atol=5e-3, rtol=5e-3)
    assert jnp.allclose(log_softmax_out, ref_lsm, atol=5e-3, rtol=5e-3)

    print("KERNEL_OK")
</pallas_src>

<mosaic_0001>
module attributes {stable_mosaic.version = 11 : i64} {
  func.func @_mlp_kernel(%arg0: memref<8x128xf32, #tpu.memory_space<vmem>>, %arg1: memref<384x128xbf16, #tpu.memory_space<vmem>>, %arg2: memref<8x128xf32, #tpu.memory_space<vmem>>, %arg3: memref<3x8x128xf32, #tpu.memory_space<vmem>>) attributes {dimension_semantics = [], scalar_prefetch = 0 : i64, scratch_operands = 0 : i64, tpu.core_type = #tpu.core_type<tc>} {
    %c0 = arith.constant 0 : index
    %c0_0 = arith.constant 0 : index
    %0 = vector.load %arg0[%c0, %c0_0] : memref<8x128xf32, #tpu.memory_space<vmem>>, vector<8x128xf32>
    %1 = arith.truncf %0 : vector<8x128xf32> to vector<8x128xbf16>
    %c0_1 = arith.constant 0 : index
    %c0_2 = arith.constant 0 : index
    %2 = vector.load %arg2[%c0_1, %c0_2] : memref<8x128xf32, #tpu.memory_space<vmem>>, vector<8x128xf32>
    %3 = vector.extract_strided_slice %2 {offsets = [0, 0], sizes = [1, 128], strides = [1, 1]} : vector<8x128xf32> to vector<1x128xf32>
    %4 = vector.extract_strided_slice %2 {offsets = [1, 0], sizes = [1, 128], strides = [1, 1]} : vector<8x128xf32> to vector<1x128xf32>
    %5 = vector.extract_strided_slice %2 {offsets = [2, 0], sizes = [1, 128], strides = [1, 1]} : vector<8x128xf32> to vector<1x128xf32>
    %c0_3 = arith.constant 0 : index
    %c0_4 = arith.constant 0 : index
    %6 = vector.load %arg1[%c0_3, %c0_4] : memref<384x128xbf16, #tpu.memory_space<vmem>>, vector<128x128xbf16>
    %cst = arith.constant dense<0.000000e+00> : vector<8x128xf32>
    %7 = tpu.matmul %1, %6, %cst {dimension_numbers = #tpu.dot_dimension_numbers<[1], [0], [0], [1], [0, 0, 1, 1], [], []>} : vector<8x128xbf16>, vector<128x128xbf16>, vector<8x128xf32> -> vector<8x128xf32>
    %8 = vector.broadcast %3 : vector<1x128xf32> to vector<8x128xf32>
    %9 = arith.addf %7, %8 : vector<8x128xf32>
    %cst_5 = arith.constant 0.000000e+00 : f32
    %10 = vector.broadcast %cst_5 : f32 to vector<8x128xf32>
    %11 = arith.maximumf %9, %10 : vector<8x128xf32>
    %12 = arith.truncf %11 : vector<8x128xf32> to vector<8x128xbf16>
    %c128 = arith.constant 128 : index
    %c0_6 = arith.constant 0 : index
    %13 = vector.load %arg1[%c128, %c0_6] : memref<384x128xbf16, #tpu.memory_space<vmem>>, vector<128x128xbf16>
    %cst_7 = arith.constant dense<0.000000e+00> : vector<8x128xf32>
    %14 = tpu.matmul %12, %13, %cst_7 {dimension_numbers = #tpu.dot_dimension_numbers<[1], [0], [0], [1], [0, 0, 1, 1], [], []>} : vector<8x128xbf16>, vector<128x128xbf16>, vector<8x128xf32> -> vector<8x128xf32>
    %15 = vector.broadcast %4 : vector<1x128xf32> to vector<8x128xf32>
    %16 = arith.addf %14, %15 : vector<8x128xf32>
    %cst_8 = arith.constant 0.000000e+00 : f32
    %17 = vector.broadcast %cst_8 : f32 to vector<8x128xf32>
    %18 = arith.maximumf %16, %17 : vector<8x128xf32>
    %19 = arith.truncf %18 : vector<8x128xf32> to vector<8x128xbf16>
    %c256 = arith.constant 256 : index
    %c0_9 = arith.constant 0 : index
    %20 = vector.load %arg1[%c256, %c0_9] : memref<384x128xbf16, #tpu.memory_space<vmem>>, vector<128x128xbf16>
    %cst_10 = arith.constant dense<0.000000e+00> : vector<8x128xf32>
    %21 = tpu.matmul %19, %20, %cst_10 {dimension_numbers = #tpu.dot_dimension_numbers<[1], [0], [0], [1], [0, 0, 1, 1], [], []>} : vector<8x128xbf16>, vector<128x128xbf16>, vector<8x128xf32> -> vector<8x128xf32>
    %22 = vector.broadcast %5 : vector<1x128xf32> to vector<8x128xf32>
    %23 = arith.addf %21, %22 : vector<8x128xf32>
    %24 = tpu.iota {dimensions = array<i32: 1>} : vector<8x128xi32>
    %c8_i32 = arith.constant 8 : i32
    %25 = vector.broadcast %c8_i32 : i32 to vector<8x128xi32>
    %26 = arith.cmpi slt, %24, %25 : vector<8x128xi32>
    %cst_11 = arith.constant -1.000000e+30 : f32
    %27 = vector.broadcast %cst_11 : f32 to vector<8x128xf32>
    %28 = arith.select %26, %23, %27 : vector<8x128xi1>, vector<8x128xf32>
    %cst_12 = arith.constant dense<0xFF800000> : vector<8xf32>
    %29 = vector.multi_reduction <maximumf>, %28, %cst_12 [1] : vector<8x128xf32> to vector<8xf32>
    %30 = vector.shape_cast %29 : vector<8xf32> to vector<8x1xf32>
    %31 = vector.broadcast %30 : vector<8x1xf32> to vector<8x128xf32>
    %32 = arith.subf %28, %31 : vector<8x128xf32>
    %33 = math.exp %32 : vector<8x128xf32>
    %cst_13 = arith.constant dense<0.000000e+00> : vector<8xf32>
    %34 = vector.multi_reduction <add>, %33, %cst_13 [1] : vector<8x128xf32> to vector<8xf32>
    %35 = vector.shape_cast %34 : vector<8xf32> to vector<8x1xf32>
    %36 = tpu.reciprocal %35 {approx = true} : vector<8x1xf32> -> vector<8x1xf32>
    %37 = vector.broadcast %36 : vector<8x1xf32> to vector<8x128xf32>
    %38 = arith.mulf %33, %37 : vector<8x128xf32>
    %39 = math.log %35 : vector<8x1xf32>
    %40 = vector.broadcast %39 : vector<8x1xf32> to vector<8x128xf32>
    %41 = arith.subf %32, %40 : vector<8x128xf32>
    %cst_14 = arith.constant 0.000000e+00 : f32
    %42 = vector.broadcast %cst_14 : f32 to vector<8x128xf32>
    %43 = arith.select %26, %41, %42 : vector<8x128xi1>, vector<8x128xf32>
    %c0_15 = arith.constant 0 : index
    %c0_16 = arith.constant 0 : index
    %c0_17 = arith.constant 0 : index
    %44 = vector.load %arg3[%c0_15, %c0_16, %c0_17] : memref<3x8x128xf32, #tpu.memory_space<vmem>>, vector<1x8x128xf32>
    %45 = vector.shape_cast %44 : vector<1x8x128xf32> to vector<8x128xf32>
    %46 = vector.shape_cast %23 : vector<8x128xf32> to vector<1x8x128xf32>
    tpu.vector_store %arg3[%c0_15, %c0_16, %c0_17], %46 {strides = array<i32>} : memref<3x8x128xf32, #tpu.memory_space<vmem>>, vector<1x8x128xf32>,
    %c1 = arith.constant 1 : index
    %c0_18 = arith.constant 0 : index
    %c0_19 = arith.constant 0 : index
    %47 = vector.load %arg3[%c1, %c0_18, %c0_19] : memref<3x8x128xf32, #tpu.memory_space<vmem>>, vector<1x8x128xf32>
    %48 = vector.shape_cast %47 : vector<1x8x128xf32> to vector<8x128xf32>
    %49 = vector.shape_cast %38 : vector<8x128xf32> to vector<1x8x128xf32>
    tpu.vector_store %arg3[%c1, %c0_18, %c0_19], %49 {strides = array<i32>} : memref<3x8x128xf32, #tpu.memory_space<vmem>>, vector<1x8x128xf32>,
    %c2 = arith.constant 2 : index
    %c0_20 = arith.constant 0 : index
    %c0_21 = arith.constant 0 : index
    %50 = vector.load %arg3[%c2, %c0_20, %c0_21] : memref<3x8x128xf32, #tpu.memory_space<vmem>>, vector<1x8x128xf32>
    %51 = vector.shape_cast %50 : vector<1x8x128xf32> to vector<8x128xf32>
    %52 = vector.shape_cast %43 : vector<8x128xf32> to vector<1x8x128xf32>
    tpu.vector_store %arg3[%c2, %c0_20, %c0_21], %52 {strides = array<i32>} : memref<3x8x128xf32, #tpu.memory_space<vmem>>, vector<1x8x128xf32>,
    return
  }
}

</mosaic_0001>

<bundles_post_ra>
// kernel: tpu_custom_call.1
= control target key start
LH: loop header
LB: loop body
LE: loop exit
PB: predicated region body
PF: predicated region fallthrough
CT: control target
= control target key end

     0   :  { %8 = vsyncpa [#allocation3], 0  ;;  %s779_s0 = inlined_call_operand.hbm [shape: f32[8,128], index: 0, kind: input, shape index: {}]   ;;  %s780_s1 = inlined_call_operand.hbm [shape: bf16[384,128], index: 1, kind: input, shape index: {}]   ;;  %s781_s2 = inlined_call_operand.hbm [shape: f32[8,128], index: 2, kind: input, shape index: {}]   ;;  %s782_s3 = inlined_call_operand.hbm [shape: f32[3,8,128], index: 3, kind: output, shape index: {}]  }
   0x1   :  { %9 = vsyncpa [#allocation6], 0 }
   0x2   :  { %10 = vsyncpa [#allocation4], 0  ;;  %s669_s12 = smov [#allocation5]   ;;  %s575_s16 = scalar_lea.hbm %s780_s1, 3072 }
   0x3   :  { %s26_s13 = sshll.u32 %s669_s12, 4  ;;  %p576_p0 = scmp.ne.s32.totalorder %s780_s1, %s575_s16  ;;  %s27_s13 = int_to_ptr.vmem [resolvable:$true] %s26_s13 }
   0x4   :  { %p579_p1 = scmp.lt.u32.totalorder %s575_s16, %s780_s1 }
   0x6   :  { %p581_p2 = pnand %p579_p1, %p576_p0 }
   0x8   :  { %584 = shalt.err (!%p581_p2)
}
   0x9   :  { %s585_s21 = scalar_lea.vmem %s27_s13, 3072  ;;  %p590_p4 = scmp.lt.s32.totalorder %s27_s13, %s27_s13 }
   0xa   :  { %p586_p3 = scmp.ne.s32.totalorder %s27_s13, %s585_s21  ;;  %p591_p5 = scmp.lt.s32.totalorder %s585_s21, %s585_s21 }
   0xc   :  { %p592_p6 = por %p591_p5, %p590_p4 }
   0xe   :  { %p593_p7 = pnand %p592_p6, %p586_p3 }
  0x10   :  { %596 = shalt.err (!%p593_p7)
}
  0x11   :  { %s670_s22 = smov 64   ;;  %s671_s23 = smov 4  }
  0x12   :  { %32 = dma.hbm_to_vmem [thread:$0]  %s780_s1, 3072, %s27_s13, [#allocation6], %s670_s22, %s670_s22, %s671_s23  }
  0x13   :  { %s672_s26 = smov [#allocation2]   ;;  %s673_s28 = smov [#allocation7]  }
  0x14   :  { %s17_s27 = sshll.u32 %s672_s26, 4  ;;  %s39_s29 = sshll.u32 %s673_s28, 4  ;;  %s18_s27 = int_to_ptr.vmem [resolvable:$true] %s17_s27  ;;  %s40_s29 = int_to_ptr.vmem [resolvable:$true] %s39_s29 }
  0x15   :  { %s597_s5 = scalar_lea.hbm %s779_s0, 128 }
  0x16   :  { %p598_p8 = scmp.ne.s32.totalorder %s779_s0, %s597_s5  ;;  %p601_p9 = scmp.lt.u32.totalorder %s597_s5, %s779_s0 }
  0x18   :  { %p603_p10 = pnand %p601_p9, %p598_p8 }
  0x1a   :  { %606 = shalt.err (!%p603_p10)
}
  0x1b   :  { %s607_s1 = scalar_lea.vmem %s18_s27, 128  ;;  %p612_p12 = scmp.lt.s32.totalorder %s18_s27, %s18_s27 }
  0x1c   :  { %p608_p11 = scmp.ne.s32.totalorder %s18_s27, %s607_s1  ;;  %p613_p13 = scmp.lt.s32.totalorder %s607_s1, %s607_s1 }
  0x1e   :  { %p614_p0 = por %p613_p13, %p612_p12 }
  0x20   :  { %p615_p1 = pnand %p614_p0, %p608_p11 }
  0x22   :  { %618 = shalt.err (!%p615_p1)
}
  0x23   :  { %20 = dma.hbm_to_vmem [thread:$0]  %s779_s0, 128, %s18_s27, [#allocation3]  }
  0x24   :  { %s619_s14 = scalar_lea.hbm %s781_s2, 128 }
  0x25   :  { %p620_p2 = scmp.ne.s32.totalorder %s781_s2, %s619_s14  ;;  %p623_p3 = scmp.lt.u32.totalorder %s619_s14, %s781_s2 }
  0x27   :  { %p625_p4 = pnand %p623_p3, %p620_p2 }
  0x29   :  { %628 = shalt.err (!%p625_p4)
}
  0x2a   :  { %s629_s19 = scalar_lea.vmem %s40_s29, 128  ;;  %p634_p6 = scmp.lt.s32.totalorder %s40_s29, %s40_s29 }
  0x2b   :  { %p630_p5 = scmp.ne.s32.totalorder %s40_s29, %s629_s19  ;;  %p635_p7 = scmp.lt.s32.totalorder %s629_s19, %s629_s19 }
  0x2d   :  { %p636_p8 = por %p635_p7, %p634_p6 }
  0x2f   :  { %p637_p9 = pnand %p636_p8, %p630_p5 }
  0x31   :  { %640 = shalt.err (!%p637_p9)
}
  0x32   :  { %42 = dma.hbm_to_vmem [thread:$0]  %s781_s2, 128, %s40_s29, [#allocation6]  }
  0x33   :  { %663 = dma.done.wait [#allocation3], 128  }
  0x34   :  { %664 = vsyncadd [#allocation3], 4294967168 }
  0x35   :  { %665 = dma.done.wait [#allocation6], 3200  }
  0x36   :  { %666 = vsyncadd [#allocation6], 4294964096  ;;  %v674_v0 = vmov 0.0   ;;  %vm675_vm0 = vmmov 0   ;;  %v545_v1 = vld [vmem:[#allocation5] sm:$0xff]   ;;  %v546_v2 = vld [vmem:[#allocation5 + $0x8] sm:$0xff]   ;;  %v72_v25 = vlaneseq }
  0x37   :  { %475 = vmatprep.subr.bf16.mxu0 %v674_v0  ;;  %491 = vmatprep.mubr.msk.bf16.mxu0 %vm675_vm0, %v674_v0  ;;  %v547_v3 = vld [vmem:[#allocation5 + $0x10] sm:$0xff]   ;;  %v553_v4 = vld [vmem:[#allocation5 + $0x40] sm:$0xff]   ;;  %v548_v5 = vld [vmem:[#allocation5 + $0x18] sm:$0xff]   ;;  %s676_s2 = smov [#allocation8]  }
  0x38   :  { %495 = vmatprep.subr.bf16.mxu1 %v674_v0  ;;  %511 = vmatprep.mubr.msk.bf16.mxu1 %vm675_vm0, %v674_v0  ;;  %v554_v6 = vld [vmem:[#allocation5 + $0x48] sm:$0xff]   ;;  %v549_v7 = vld [vmem:[#allocation5 + $0x20] sm:$0xff]   ;;  %v555_v8 = vld [vmem:[#allocation5 + $0x50] sm:$0xff]   ;;  %v73_v26 = vshrl.u32 %v72_v25, 7  ;;  %v385_v49 = vand.u32 127, %v72_v25  ;;  %s411_s21 = sshll.u32 %s676_s2, 4  ;;  %s412_s21 = int_to_ptr.vmem [resolvable:$true] %s411_s21 }
  0x39   :  { %476 = vmatpush3.bf16.msra.mxu0 %v545_v1  ;;  %496 = vmatpush3.bf16.msra.mxu1 %v553_v4  ;;  %v550_v9 = vld [vmem:[#allocation5 + $0x28] sm:$0xff]   ;;  %v556_v10 = vld [vmem:[#allocation5 + $0x58] sm:$0xff]   ;;  %v551_v11 = vld [vmem:[#allocation5 + $0x30] sm:$0xff]   ;;  %s641_s22 = scalar_lea.vmem %s412_s21, 384  ;;  %p646_p11 = scmp.lt.s32.totalorder %s412_s21, %s412_s21 }
  0x3a   :  { %477 = vmatprep.subr.bf16.mxu0 %v674_v0  ;;  %497 = vmatprep.subr.bf16.mxu1 %v674_v0  ;;  %v557_v12 = vld [vmem:[#allocation5 + $0x60] sm:$0xff]   ;;  %v552_v13 = vld [vmem:[#allocation5 + $0x38] sm:$0xff]   ;;  %v558_v15 = vld [vmem:[#allocation5 + $0x68] sm:$0xff]   ;;  %v74_v27 = vsub.s32 0, %v73_v26  ;;  %v184_v39 = vsub.s32 1, %v73_v26  ;;  %v294_v48 = vsub.s32 2, %v73_v26  ;;  %p642_p10 = scmp.ne.s32.totalorder %s412_s21, %s641_s22  ;;  %p647_p12 = scmp.lt.s32.totalorder %s641_s22, %s641_s22 }
  0x3b   :  { %v53_v14 = vld [vmem:[#allocation2] sm:$0xff]  ;;  %v559_v17 = vld [vmem:[#allocation5 + $0x70] sm:$0xff]   ;;  %v561_v19 = vld [vmem:[#allocation5 + $0x80] sm:$0xff]   ;;  %vm386_vm1 = vcmp.lt.s32.totalorder %v385_v49, 8 }
  0x3c   :  { %v54_v16 = vpack.c.bf16 %v53_v14, %v53_v14  ;;  %v560_v18 = vld [vmem:[#allocation5 + $0x78] sm:$0xff]   ;;  %v562_v20 = vld [vmem:[#allocation5 + $0x88] sm:$0xff]   ;;  %v563_v21 = vld [vmem:[#allocation5 + $0x90] sm:$0xff]   ;;  %p648_p13 = por %p647_p12, %p646_p11 }
  0x3d   :  { %478 = vmatpush3.bf16.msra.mxu0 %v546_v2  ;;  %498 = vmatpush3.bf16.msra.mxu1 %v554_v6  ;;  %v564_v22 = vld [vmem:[#allocation5 + $0x98] sm:$0xff]   ;;  %v565_v23 = vld [vmem:[#allocation5 + $0xa0] sm:$0xff]   ;;  %v566_v24 = vld [vmem:[#allocation5 + $0xa8] sm:$0xff]  }
  0x3e   :  { %479 = vmatprep.subr.bf16.mxu0 %v674_v0  ;;  %499 = vmatprep.subr.bf16.mxu1 %v674_v0  ;;  %v55_v28 = vld [vmem:[#allocation7] sm:$0xff]  ;;  %v567_v37 = vld [vmem:[#allocation5 + $0xb0] sm:$0xff]   ;;  %v568_v38 = vld [vmem:[#allocation5 + $0xb8] sm:$0xff]   ;;  %p649_p0 = pnand %p648_p13, %p642_p10 }
  0x3f   :  { %v75_v29 = vrot.slane %v55_v28, %v74_v27  ;;  %v185_v40 = vrot.slane %v55_v28, %v184_v39  ;;  %v295_v50 = vrot.slane %v55_v28, %v294_v48 }
  0x41   :  { %480 = vmatpush3.bf16.msra.mxu0 %v547_v3  ;;  %500 = vmatpush3.bf16.msra.mxu1 %v555_v8 }
  0x42   :  { %481 = vmatprep.subr.bf16.mxu0 %v674_v0  ;;  %501 = vmatprep.subr.bf16.mxu1 %v674_v0 }
  0x45   :  { %482 = vmatpush3.bf16.msra.mxu0 %v548_v5  ;;  %502 = vmatpush3.bf16.msra.mxu1 %v556_v10 }
  0x46   :  { %483 = vmatprep.subr.bf16.mxu0 %v674_v0  ;;  %503 = vmatprep.subr.bf16.mxu1 %v674_v0 }
  0x49   :  { %484 = vmatpush3.bf16.msra.mxu0 %v549_v7  ;;  %504 = vmatpush3.bf16.msra.mxu1 %v557_v12 }
  0x4a   :  { %485 = vmatprep.subr.bf16.mxu0 %v674_v0  ;;  %505 = vmatprep.subr.bf16.mxu1 %v674_v0 }
  0x4d   :  { %486 = vmatpush3.bf16.msra.mxu0 %v550_v9  ;;  %506 = vmatpush3.bf16.msra.mxu1 %v558_v15 }
  0x4e   :  { %487 = vmatprep.subr.bf16.mxu0 %v674_v0  ;;  %507 = vmatprep.subr.bf16.mxu1 %v674_v0 }
  0x51   :  { %488 = vmatpush3.bf16.msra.mxu0 %v551_v11  ;;  %508 = vmatpush3.bf16.msra.mxu1 %v559_v17 }
  0x52   :  { %489 = vmatprep.subr.bf16.mxu0 %v674_v0  ;;  %509 = vmatprep.subr.bf16.mxu1 %v674_v0 }
  0x55   :  { %490 = vmatpush3.bf16.msra.mxu0 %v552_v13  ;;  %510 = vmatpush3.bf16.msra.mxu1 %v560_v18 }
  0x56   :  { %515 = vmatprep.subr.bf16.mxu0 %v674_v0 }
  0x58   :  { %492 = vmatmul.mubr.bf16.vlgmr.msra.gmra.mrb[0].mxu0 %v54_v16 }
  0x59   :  { %531 = vmatprep.mubr.msk.bf16.mxu0 %vm675_vm0, %v674_v0  ;;  %516 = vmatpush3.bf16.msra.mxu0 %v561_v19 }
  0x5a   :  { %517 = vmatprep.subr.bf16.mxu0 %v674_v0 }
  0x5d   :  { %518 = vmatpush3.bf16.msra.mxu0 %v562_v20 }
  0x5e   :  { %519 = vmatprep.subr.bf16.mxu0 %v674_v0 }
  0x61   :  { %520 = vmatpush3.bf16.msra.mxu0 %v563_v21 }
  0x62   :  { %521 = vmatprep.subr.bf16.mxu0 %v674_v0 }
  0x65   :  { %522 = vmatpush3.bf16.msra.mxu0 %v564_v22 }
  0x66   :  { %523 = vmatprep.subr.bf16.mxu0 %v674_v0 }
  0x69   :  { %524 = vmatpush3.bf16.msra.mxu0 %v565_v23 }
  0x6a   :  { %525 = vmatprep.subr.bf16.mxu0 %v674_v0 }
  0x6d   :  { %526 = vmatpush3.bf16.msra.mxu0 %v566_v24 }
  0x6e   :  { %527 = vmatprep.subr.bf16.mxu0 %v674_v0 }
  0x71   :  { %528 = vmatpush3.bf16.msra.mxu0 %v567_v37 }
  0x72   :  { %529 = vmatprep.subr.bf16.mxu0 %v674_v0 }
  0x75   :  { %530 = vmatpush3.bf16.msra.mxu0 %v568_v38 }
 0x12b   :  { %v158_v30 = vpop.f32.mrb[0].mxu0 }
 0x12c   :  { %v159_v31 = vadd.f32 %v158_v30, %v75_v29  ;;  %v493_v32 = vpop.f32.mrb[1].mxu0 }
 0x12d   :  { %v161_v33 = vpop.f32.mrb[2].mxu0 }
 0x12e   :  { %v164_v34 = vmax.f32 %v159_v31, 0.0  ;;  %v494_v35 = vpop.f32.mrb[3].mxu0 }
 0x130   :  { %v165_v36 = vpack.c.bf16 %v164_v34, %v164_v34 }
 0x132   :  { %512 = vmatmul.mubr.bf16.vlgmr.msra.gmra.mrb[0].mxu1 %v165_v36 }
 0x205   :  { %v268_v41 = vpop.f32.mrb[0].mxu1 }
 0x206   :  { %v269_v42 = vadd.f32 %v268_v41, %v185_v40  ;;  %v513_v43 = vpop.f32.mrb[1].mxu1 }
 0x207   :  { %v271_v44 = vpop.f32.mrb[2].mxu1 }
 0x208   :  { %v274_v45 = vmax.f32 %v269_v42, 0.0  ;;  %v514_v46 = vpop.f32.mrb[3].mxu1 }
 0x20a   :  { %v275_v47 = vpack.c.bf16 %v274_v45, %v274_v45 }
 0x20c   :  { %532 = vmatmul.mubr.bf16.vlgmr.msra.gmra.mrb[4].mxu0 %v275_v47 }
 0x2df   :  { %v378_v51 = vpop.f32.mrb[4].mxu0 }
 0x2e0   :  { %v379_v52 = vadd.f32 %v378_v51, %v295_v50  ;;  %v533_v53 = vpop.f32.mrb[5].mxu0 }
 0x2e1   :  { %v381_v54 = vpop.f32.mrb[6].mxu0 }
 0x2e2   :  { %401 = vst [vmem:[#allocation8] sm:$0xff] %v379_v52  ;;  %v534_v55 = vpop.f32.mrb[7].mxu0  ;;  %v387_v56 = vsel %vm386_vm1, %v379_v52, -1e+30 }
 0x2e3   :  { %388 = vmax.xlane.f32.xlu0 %v387_v56 }
 0x370   :  { %v389_v57 = vpop.xlane.xlu0 %388 }
 0x371   :  { %v390_v58 = vsub.f32 %v387_v56, %v389_v57 }
 0x373   :  { %v391_v59 = vmul.f32 1.442695, %v390_v58 }
 0x375   :  { %569 = vpow2.f32 %v391_v59 }
 0x37f   :  { %v570_v60 = vpop.eup %569 }
 0x380   :  { %393 = vadd.xlane.f32.xlu0 %v570_v60 }
 0x40d   :  { %v394_v61 = vpop.xlane.xlu0 %393 }
 0x40e   :  { %571 = vrcp.f32 %v394_v61 }
 0x40f   :  { %573 = vlog2.f32 %v394_v61 }
 0x418   :  { %v572_v62 = vpop.eup %571 }
 0x419   :  { %v574_v63 = vpop.eup %573  ;;  %v396_v0 = vmul.f32 %v572_v62, %v570_v60 }
 0x41a   :  { %v398_v1 = vmul.f32 0.6931472, %v574_v63 }
 0x41b   :  { %403 = vst [vmem:[#allocation8 + $0x8] sm:$0xff] %v396_v0 }
 0x41c   :  { %v399_v2 = vsub.f32 %v390_v58, %v398_v1 }
 0x41e   :  { %v400_v3 = vsel %vm386_vm1, %v399_v2, 0.0 }
 0x41f   :  { %405 = vst [vmem:[#allocation8 + $0x10] sm:$0xff] %v400_v3 }
 0x420   :  { %652 = shalt.err (!%p649_p0)
}
 0x421   :  { %s653_s25 = scalar_lea.hbm %s782_s3, 384 }
 0x422   :  { %p654_p1 = scmp.ne.s32.totalorder %s782_s3, %s653_s25  ;;  %p657_p2 = scmp.lt.u32.totalorder %s653_s25, %s782_s3 }
 0x424   :  { %p659_p3 = pnand %p657_p2, %p654_p1 }
 0x426   :  { %662 = shalt.err (!%p659_p3)
}
 0x427   :  { %s677_s30 = smov 128   ;;  %s678_s4 = smov 8  }
 0x428   :  { %417 = dma.vmem_to_hbm [thread:$0]  %s412_s21, 384, %s782_s3, [#allocation4], %s677_s30, %s677_s30, %s678_s4  }
 0x429   :  { %667 = dma.done.wait [#allocation4], 384  }
 0x42a   :  { %668 = vsyncadd [#allocation4], 4294966912 }
 0x42b   :  { %421 = vsyncpa [#allocation3], 1 }
 0x42c   :  { %422 = vsyncpa [#allocation6], 1 }
 0x42d   :  { %423 = vsyncpa [#allocation4], 1 }

</bundles_post_ra>
